<compile_context>
chip_gen: v6e
topology: v6e:2x2x1
jax: 0.10.0
libtpu: 0.0.40
codegen_flags: <defaults>
</compile_context>

<pallas_src>
import functools

import jax
import jax.numpy as jnp
from jax.experimental import pallas as pl
from jax.experimental.pallas import tpu as pltpu


# ---------------------------------------------------------------------------
# Kernel factory
# ---------------------------------------------------------------------------
@functools.lru_cache(maxsize=None)
def _make_linear_kernel(has_bias: bool, use_scratch: bool):
    """Y = X @ Wt (+ b).

    Grid = (M_tiles, N_tiles, K_tiles); K is the reduction axis (last, 'arbitrary').
    The output BlockSpec ignores k, so the output block stays resident in VMEM across
    the K sweep and is written back to HBM only once per (i, j) tile.

    has_bias    : bias operand present (adds one (1, tn) ref after x / wt).
    use_scratch : accumulate into an explicit f32 VMEM scratch (for non-f32 outputs);
                  otherwise accumulate directly into the f32 output block.
    """

    def kernel(*refs):
        if has_bias:
            x_ref, wt_ref, b_ref = refs[0], refs[1], refs[2]
            o_ref = refs[3]
            acc_ref = refs[4] if use_scratch else o_ref
        else:
            x_ref, wt_ref = refs[0], refs[1]
            o_ref = refs[2]
            acc_ref = refs[3] if use_scratch else o_ref

        k = pl.program_id(2)

        @pl.when(k == 0)
        def _():
            acc_ref[...] = jnp.zeros_like(acc_ref)

        acc_ref[...] += jnp.dot(
            x_ref[...], wt_ref[...], preferred_element_type=jnp.float32
        )

        if has_bias or use_scratch:
            @pl.when(k == pl.num_programs(2) - 1)
            def _():
                result = acc_ref[...]
                if has_bias:
                    # (1, tn) bias broadcasts over the (tm, tn) tile.
                    result = result + b_ref[...].astype(jnp.float32)
                o_ref[...] = result.astype(o_ref.dtype)

    return kernel


# ---------------------------------------------------------------------------
# Tiling helper
# ---------------------------------------------------------------------------
def _choose_tile(size, target, granule):
    """Largest tile <= target that is a multiple of `granule` and divides `size`;
    if `size` itself is <= target (or nothing divides), use the full dimension
    (a full-extent block is always a legal BlockSpec shape)."""
    if size <= target:
        return size
    t = (target // granule) * granule
    while t >= granule:
        if size % t == 0:
            return t
        t -= granule
    return size  # fall back to a single full-size block along this axis


# ---------------------------------------------------------------------------
# Parameter prep (do once at load time, NOT per forward call)
# ---------------------------------------------------------------------------
def prepare_weight(weight, compute_dtype=None):
    """Transpose the F.linear weight (N, K) -> (K, N) once, and optionally cast it
    to the MXU compute dtype (e.g. jnp.bfloat16)."""
    wt = jnp.asarray(weight).T
    if compute_dtype is not None:
        wt = wt.astype(compute_dtype)
    return wt


# ---------------------------------------------------------------------------
# Forward
# ---------------------------------------------------------------------------
@functools.partial(
    jax.jit,
    static_argnames=("tm_target", "tn_target", "tk_target", "compute_dtype"),
)
def column_parallel_linear_ag(
    x,
    weight_t,
    bias=None,
    *,
    tm_target=256,
    tn_target=512,
    tk_target=512,
    compute_dtype=None,
):
    """Forward of ColumnParallelLinearAG (world_size == 1).

    x        : (1, S, K)  activations (batch must be 1, matching the module assert)
    weight_t : (K, N)     pre-transposed weight from prepare_weight()
    bias     : (N,) or None
    returns  : (1, S, N)  in x.dtype
    """
    b_, S, K = x.shape
    assert b_ == 1, "Batch size should be 1 (sequence-parallel all-gather assert)"
    Kw, N = weight_t.shape
    assert Kw == K, "weight_t must be the pre-transposed (in_features, out_features) weight"

    out_dtype = x.dtype
    has_bias = bias is not None
    use_scratch = out_dtype != jnp.float32

    x2d = x.reshape(S, K)
    if compute_dtype is not None:
        x2d = x2d.astype(compute_dtype)
        # weight_t is expected to already be in compute_dtype (done in prepare_weight).

    # Tile sizes: large M to fill MXU rows, large (lane-dense) N, 512-multiple K.
    # All multiples of 128 in the lane dim, so every chip generation is happy.
    tm = _choose_tile(S, tm_target, 8)
    tn = _choose_tile(N, tn_target, 128)
    tk = _choose_tile(K, tk_target, 128)

    grid = (pl.cdiv(S, tm), pl.cdiv(N, tn), pl.cdiv(K, tk))

    in_specs = [
        pl.BlockSpec((tm, tk), lambda i, j, k: (i, k)),  # X tile
        pl.BlockSpec((tk, tn), lambda i, j, k: (k, j)),  # W^T tile
    ]
    operands = [x2d, weight_t]
    if has_bias:
        # (1, tn) block; index only changes with j, so it is not re-DMA'd across k.
        in_specs.append(pl.BlockSpec((1, tn), lambda i, j, k: (0, j)))
        operands.append(bias.reshape(1, N))

    scratch_shapes = [pltpu.VMEM((tm, tn), jnp.float32)] if use_scratch else []

    itemsize = jnp.dtype(x2d.dtype).itemsize
    cost = pl.CostEstimate(
        flops=2 * S * K * N + (S * N if has_bias else 0),
        transcendentals=0,
        bytes_accessed=(S * K + K * N) * itemsize
        + S * N * jnp.dtype(out_dtype).itemsize,
    )

    out2d = pl.pallas_call(
        _make_linear_kernel(has_bias, use_scratch),
        out_shape=jax.ShapeDtypeStruct((S, N), out_dtype),
        grid_spec=pltpu.PrefetchScalarGridSpec(
            num_scalar_prefetch=0,
            grid=grid,
            in_specs=in_specs,
            out_specs=pl.BlockSpec((tm, tn), lambda i, j, k: (i, j)),
            scratch_shapes=scratch_shapes,
        ),
        compiler_params=pltpu.CompilerParams(
            # i / j are independent -> megacore-shardable on v7x; k is the reduction.
            dimension_semantics=("parallel", "parallel", "arbitrary"),
        ),
        cost_estimate=cost,
    )(*operands)

    return out2d.reshape(1, S, N)


# ---------------------------------------------------------------------------
# Self-test
# ---------------------------------------------------------------------------
if __name__ == "__main__":
    key = jax.random.PRNGKey(0)
    k1, k2, k3, k4 = jax.random.split(key, 4)

    def make_inputs(kx, kw, seq, in_features, out_features):
        x = jax.random.normal(kx, (1, seq, in_features), dtype=jnp.float32)
        std = (2.0 / (in_features + out_features)) ** 0.5  # xavier-normal-like
        w = std * jax.random.normal(kw, (out_features, in_features), dtype=jnp.float32)
        b = jnp.zeros((out_features,), dtype=jnp.float32)  # bias zeroed as in __init__
        return x, w, b

    def reference(x, w, b=None):
        y = jnp.einsum("bsk,nk->bsn", x, w)
        return y if b is None else y + b

    # --- Test 1: small module-consistent shapes (single-block grid), f32 + bias ---
    x, w, b = make_inputs(k1, k2, seq=8, in_features=256, out_features=128)
    wt = prepare_weight(w)  # one-time transpose, outside the hot path
    out = jax.block_until_ready(column_parallel_linear_ag(x, wt, b))
    ref = reference(x, w, b)
    assert out.shape == (1, 8, 128)
    assert jnp.allclose(out, ref, atol=1e-4, rtol=1e-4), "f32 single-block mismatch"

    # --- Test 2: multi-block grid (exercises the K reduction loop), f32 + bias ---
    x2, w2, b2 = make_inputs(k3, k4, seq=16, in_features=512, out_features=256)
    wt2 = prepare_weight(w2)
    out2 = jax.block_until_ready(
        column_parallel_linear_ag(
            x2, wt2, b2, tm_target=8, tn_target=128, tk_target=128
        )
    )
    ref2 = reference(x2, w2, b2)
    assert out2.shape == (1, 16, 256)
    assert jnp.allclose(out2, ref2, atol=1e-4, rtol=1e-4), "f32 multi-block mismatch"

    # --- Test 3: no-bias fast path (module built with bias=False), f32 ---
    out3 = jax.block_until_ready(column_parallel_linear_ag(x2, wt2, None))
    assert jnp.allclose(out3, reference(x2, w2), atol=1e-4, rtol=1e-4), "no-bias mismatch"

    # --- Test 4: bf16 operands, f32 output (accumulate-in-output kernel) ---
    wt2_bf16 = prepare_weight(w2, compute_dtype=jnp.bfloat16)
    out4 = jax.block_until_ready(
        column_parallel_linear_ag(x2, wt2_bf16, b2, compute_dtype=jnp.bfloat16)
    )
    assert out4.dtype == jnp.float32
    assert jnp.allclose(out4, ref2, atol=5e-2, rtol=5e-2), "bf16-compute mismatch"

    # --- Test 5: bf16 activations & output (scratch-accumulator kernel) ---
    x2_bf16 = x2.astype(jnp.bfloat16)
    out5 = jax.block_until_ready(column_parallel_linear_ag(x2_bf16, wt2_bf16, b2))
    assert out5.dtype == jnp.bfloat16
    assert jnp.allclose(
        out5.astype(jnp.float32), ref2, atol=1e-1, rtol=1e-1
    ), "bf16-output mismatch"

    print("KERNEL_OK")
</pallas_src>

<mosaic_0001>
module attributes {stable_mosaic.version = 11 : i64} {
  func.func @kernel(%arg0: i32, %arg1: i32, %arg2: i32, %arg3: memref<8x256xf32, #tpu.memory_space<vmem>>, %arg4: memref<256x128xf32, #tpu.memory_space<vmem>>, %arg5: memref<1x128xf32, #tpu.memory_space<vmem>>, %arg6: memref<8x128xf32, #tpu.memory_space<vmem>>) attributes {dimension_semantics = [#tpu.dimension_semantics<parallel>, #tpu.dimension_semantics<parallel>, #tpu.dimension_semantics<arbitrary>], iteration_bounds = array<i64: 1, 1, 1>, scalar_prefetch = 0 : i64, scratch_operands = 0 : i64, tpu.core_type = #tpu.core_type<tc>, window_params = [{transform_indices = @transform_0, window_bounds = array<i64: 8, 256>}, {transform_indices = @transform_1, window_bounds = array<i64: 256, 128>}, {transform_indices = @transform_2, window_bounds = array<i64: 1, 128>}, {transform_indices = @transform_3, window_bounds = array<i64: 8, 128>}]} {
    %c0_i32 = arith.constant 0 : i32
    %0 = arith.cmpi eq, %arg2, %c0_i32 : i32
    %1 = arith.extui %0 : i1 to i32
    %c0_i32_0 = arith.constant 0 : i32
    %2 = arith.cmpi ne, %1, %c0_i32_0 : i32
    scf.if %2 {
      %cst_10 = arith.constant 0.000000e+00 : f32
      %12 = vector.broadcast %cst_10 : f32 to vector<8x128xf32>
      %c0_11 = arith.constant 0 : index
      %c0_12 = arith.constant 0 : index
      %13 = vector.load %arg6[%c0_11, %c0_12] : memref<8x128xf32, #tpu.memory_space<vmem>>, vector<8x128xf32>
      tpu.vector_store %arg6[%c0_11, %c0_12], %12 {strides = array<i32>} : memref<8x128xf32, #tpu.memory_space<vmem>>, vector<8x128xf32>,
    } else {
    }
    %c0 = arith.constant 0 : index
    %c0_1 = arith.constant 0 : index
    %3 = vector.load %arg6[%c0, %c0_1] : memref<8x128xf32, #tpu.memory_space<vmem>>, vector<8x128xf32>
    %c0_2 = arith.constant 0 : index
    %c0_3 = arith.constant 0 : index
    %4 = vector.load %arg3[%c0_2, %c0_3] : memref<8x256xf32, #tpu.memory_space<vmem>>, vector<8x256xf32>
    %c0_4 = arith.constant 0 : index
    %c0_5 = arith.constant 0 : index
    %5 = vector.load %arg4[%c0_4, %c0_5] : memref<256x128xf32, #tpu.memory_space<vmem>>, vector<256x128xf32>
    %cst = arith.constant dense<0.000000e+00> : vector<8x128xf32>
    %6 = tpu.matmul %4, %5, %cst {dimension_numbers = #tpu.dot_dimension_numbers<[1], [0], [0], [1], [0, 0, 1, 1], [], []>} : vector<8x256xf32>, vector<256x128xf32>, vector<8x128xf32> -> vector<8x128xf32>
    %7 = arith.addf %3, %6 : vector<8x128xf32>
    %c0_6 = arith.constant 0 : index
    %c0_7 = arith.constant 0 : index
    %8 = vector.load %arg6[%c0_6, %c0_7] : memref<8x128xf32, #tpu.memory_space<vmem>>, vector<8x128xf32>
    tpu.vector_store %arg6[%c0_6, %c0_7], %7 {strides = array<i32>} : memref<8x128xf32, #tpu.memory_space<vmem>>, vector<8x128xf32>,
    %c0_i32_8 = arith.constant 0 : i32
    %9 = arith.cmpi eq, %arg2, %c0_i32_8 : i32
    %10 = arith.extui %9 : i1 to i32
    %c0_i32_9 = arith.constant 0 : i32
    %11 = arith.cmpi ne, %10, %c0_i32_9 : i32
    scf.if %11 {
      %c0_10 = arith.constant 0 : index
      %c0_11 = arith.constant 0 : index
      %12 = vector.load %arg6[%c0_10, %c0_11] : memref<8x128xf32, #tpu.memory_space<vmem>>, vector<8x128xf32>
      %c0_12 = arith.constant 0 : index
      %c0_13 = arith.constant 0 : index
      %13 = vector.load %arg5[%c0_12, %c0_13] : memref<1x128xf32, #tpu.memory_space<vmem>>, vector<1x128xf32>
      %14 = vector.broadcast %13 : vector<1x128xf32> to vector<8x128xf32>
      %15 = arith.addf %12, %14 : vector<8x128xf32>
      %c0_14 = arith.constant 0 : index
      %c0_15 = arith.constant 0 : index
      %16 = vector.load %arg6[%c0_14, %c0_15] : memref<8x128xf32, #tpu.memory_space<vmem>>, vector<8x128xf32>
      tpu.vector_store %arg6[%c0_14, %c0_15], %15 {strides = array<i32>} : memref<8x128xf32, #tpu.memory_space<vmem>>, vector<8x128xf32>,
    } else {
    }
    return
  }
  func.func @transform_0(%arg0: i32, %arg1: i32, %arg2: i32) -> (i32, i32) {
    %c0_i32 = arith.constant 0 : i32
    return %arg0, %arg2 : i32, i32
  }
  func.func @transform_1(%arg0: i32, %arg1: i32, %arg2: i32) -> (i32, i32) {
    %c0_i32 = arith.constant 0 : i32
    return %arg2, %arg1 : i32, i32
  }
  func.func @transform_2(%arg0: i32, %arg1: i32, %arg2: i32) -> (i32, i32) {
    %c0_i32 = arith.constant 0 : i32
    %c0_i32_0 = arith.constant 0 : i32
    return %c0_i32, %arg1 : i32, i32
  }
  func.func @transform_3(%arg0: i32, %arg1: i32, %arg2: i32) -> (i32, i32) {
    %c0_i32 = arith.constant 0 : i32
    return %arg0, %arg1 : i32, i32
  }
}

</mosaic_0001>

<bundles_post_ra>
// kernel: column_parallel_linear_ag.1
= control target key start
LH: loop header
LB: loop body
LE: loop exit
PB: predicated region body
PF: predicated region fallthrough
CT: control target
= control target key end

     0   :  { %8 = vsyncpa [#allocation3], 0  ;;  %s327_s0 = inlined_call_operand.hbm [shape: f32[8,256], index: 0, kind: input, shape index: {}]   ;;  %s328_s1 = inlined_call_operand.hbm [shape: f32[256,128], index: 1, kind: input, shape index: {}]   ;;  %s329_s2 = inlined_call_operand.vmem [shape: f32[1,128], index: 2, kind: input, shape index: {}]   ;;  %s330_s3 = inlined_call_operand.hbm [shape: f32[8,128], index: 3, kind: output, shape index: {}]  }
   0x1   :  { %9 = vsyncpa [#allocation6], 0 }
   0x2   :  { %10 = vsyncpa [#allocation4], 0  ;;  %s290_s12 = smov [#allocation2]   ;;  %s291_s14 = smov [#allocation5]  }
   0x3   :  { %s17_s13 = sshll.u32 %s290_s12, 4  ;;  %s26_s15 = sshll.u32 %s291_s14, 4  ;;  %s18_s13 = int_to_ptr.vmem [resolvable:$true] %s17_s13  ;;  %s27_s15 = int_to_ptr.vmem [resolvable:$true] %s26_s15 }
   0x4   :  { %s232_s16 = scalar_lea.vmem %s18_s13, 256  ;;  %p237_p1 = scmp.lt.s32.totalorder %s18_s13, %s18_s13 }
   0x5   :  { %p233_p0 = scmp.ne.s32.totalorder %s18_s13, %s232_s16  ;;  %p238_p2 = scmp.lt.s32.totalorder %s232_s16, %s232_s16 }
   0x7   :  { %p239_p3 = por %p238_p2, %p237_p1 }
   0x9   :  { %p240_p4 = pnand %p239_p3, %p233_p0 }
   0xb   :  { %243 = shalt.err (!%p240_p4)
}
   0xc   :  { %20 = dma.hbm_to_vmem [thread:$0]  %s327_s0, 256, %s18_s13, [#allocation3]  }
   0xd   :  { %s252_s19 = scalar_lea.vmem %s27_s15, 4096  ;;  %p257_p6 = scmp.lt.s32.totalorder %s27_s15, %s27_s15 }
   0xe   :  { %p253_p5 = scmp.ne.s32.totalorder %s27_s15, %s252_s19  ;;  %p258_p7 = scmp.lt.s32.totalorder %s252_s19, %s252_s19 }
  0x10   :  { %p259_p8 = por %p258_p7, %p257_p6 }
  0x12   :  { %p260_p9 = pnand %p259_p8, %p253_p5 }
  0x14   :  { %263 = shalt.err (!%p260_p9)
}
  0x15   :  { %s292_s20 = smov 128   ;;  %s293_s21 = smov 8  }
  0x16   :  { %32 = dma.hbm_to_vmem [thread:$0]  %s328_s1, 4096, %s27_s15, [#allocation6], %s292_s20, %s292_s20, %s293_s21  }
  0x17   :  { %284 = dma.done.wait [#allocation3], 256  }
  0x18   :  { %285 = vsyncadd [#allocation3], 4294967040 }
  0x19   :  { %286 = dma.done.wait [#allocation6], 4096  }
  0x1a   :  { %287 = vsyncadd [#allocation6], 4294963200  ;;  %v80_v0 = vld [vmem:[#allocation5 + $0xf8] sm:$0xff]  ;;  %v79_v2 = vld [vmem:[#allocation5 + $0xf0] sm:$0xff]  ;;  %s294_s24 = smov [#allocation7]  }
  0x1b   :  { %v64_v1 = vld [vmem:[#allocation5 + $0x78] sm:$0xff]  ;;  %183 = vmatprep.subr.mxu0 %v80_v0  ;;  %v63_v3 = vld [vmem:[#allocation5 + $0x70] sm:$0xff]  ;;  %v78_v4 = vld [vmem:[#allocation5 + $0xe8] sm:$0xff]  ;;  %s172_s25 = sshll.u32 %s294_s24, 4  ;;  %s173_s25 = int_to_ptr.vmem [resolvable:$true] %s172_s25 }
  0x1c   :  { %184 = vmatpush3.msra.mxu0 %v64_v1  ;;  %v62_v5 = vld [vmem:[#allocation5 + $0x68] sm:$0xff]  ;;  %v77_v6 = vld [vmem:[#allocation5 + $0xe0] sm:$0xff]  ;;  %v76_v8 = vld [vmem:[#allocation5 + $0xd8] sm:$0xff]  ;;  %s264_s26 = scalar_lea.vmem %s173_s25, 128  ;;  %p269_p11 = scmp.lt.s32.totalorder %s173_s25, %s173_s25 }
  0x1d   :  { %185 = vmatprep.subr.mxu0 %v79_v2  ;;  %v61_v7 = vld [vmem:[#allocation5 + $0x60] sm:$0xff]  ;;  %v60_v9 = vld [vmem:[#allocation5 + $0x58] sm:$0xff]  ;;  %v75_v10 = vld [vmem:[#allocation5 + $0xd0] sm:$0xff]  ;;  %p265_p10 = scmp.ne.s32.totalorder %s173_s25, %s264_s26  ;;  %p270_p12 = scmp.lt.s32.totalorder %s264_s26, %s264_s26 }
  0x1e   :  { %186 = vmatpush3.msra.mxu0 %v63_v3  ;;  %v59_v11 = vld [vmem:[#allocation5 + $0x50] sm:$0xff]  ;;  %v74_v12 = vld [vmem:[#allocation5 + $0xc8] sm:$0xff]  ;;  %v48_v13 = vld [vmem:[#allocation2 + $0x8] sm:$0xff] }
  0x1f   :  { %187 = vmatprep.subr.mxu0 %v78_v4  ;;  %v58_v14 = vld [vmem:[#allocation5 + $0x48] sm:$0xff]  ;;  %145 = vmatprep.mubr.f32.mxu0 %v48_v13  ;;  %v73_v15 = vld [vmem:[#allocation5 + $0xc0] sm:$0xff]  ;;  %v72_v17 = vld [vmem:[#allocation5 + $0xb8] sm:$0xff]  ;;  %p271_p13 = por %p270_p12, %p269_p11 }
  0x20   :  { %188 = vmatpush3.msra.mxu0 %v62_v5  ;;  %v57_v16 = vld [vmem:[#allocation5 + $0x40] sm:$0xff]  ;;  %v56_v18 = vld [vmem:[#allocation5 + $0x38] sm:$0xff]  ;;  %v71_v19 = vld [vmem:[#allocation5 + $0xb0] sm:$0xff] }
  0x21   :  { %189 = vmatprep.subr.mxu0 %v77_v6  ;;  %v55_v20 = vld [vmem:[#allocation5 + $0x30] sm:$0xff]  ;;  %v70_v21 = vld [vmem:[#allocation5 + $0xa8] sm:$0xff]  ;;  %v69_v23 = vld [vmem:[#allocation5 + $0xa0] sm:$0xff]  ;;  %p272_p0 = pnand %p271_p13, %p265_p10 }
  0x22   :  { %190 = vmatpush3.msra.mxu0 %v61_v7  ;;  %v54_v22 = vld [vmem:[#allocation5 + $0x28] sm:$0xff]  ;;  %v53_v24 = vld [vmem:[#allocation5 + $0x20] sm:$0xff]  ;;  %v68_v25 = vld [vmem:[#allocation5 + $0x98] sm:$0xff] }
  0x23   :  { %191 = vmatprep.subr.mxu0 %v76_v8  ;;  %v52_v26 = vld [vmem:[#allocation5 + $0x18] sm:$0xff]  ;;  %v67_v27 = vld [vmem:[#allocation5 + $0x90] sm:$0xff]  ;;  %v66_v29 = vld [vmem:[#allocation5 + $0x88] sm:$0xff] }
  0x24   :  { %192 = vmatpush3.msra.mxu0 %v60_v9  ;;  %v51_v28 = vld [vmem:[#allocation5 + $0x10] sm:$0xff]  ;;  %v50_v30 = vld [vmem:[#allocation5 + $0x8] sm:$0xff]  ;;  %v65_v31 = vld [vmem:[#allocation5 + $0x80] sm:$0xff] }
  0x25   :  { %193 = vmatprep.subr.mxu0 %v75_v10  ;;  %v49_v32 = vld [vmem:[#allocation5] sm:$0xff]  ;;  %v47_v33 = vld [vmem:[#allocation2] sm:$0xff] }
  0x26   :  { %194 = vmatpush3.msra.mxu0 %v59_v11  ;;  %v182_v37 = vld [vmem:[%s329_s2] ss:$0 sm:$0xff] }
  0x27   :  { %195 = vmatprep.subr.mxu0 %v74_v12 }
  0x28   :  { %196 = vmatpush3.msra.mxu0 %v58_v14 }
  0x29   :  { %197 = vmatprep.subr.mxu0 %v73_v15 }
  0x2a   :  { %198 = vmatpush3.msra.mxu0 %v57_v16 }
  0x2b   :  { %199 = vmatprep.subr.mxu0 %v72_v17 }
  0x2c   :  { %200 = vmatpush3.msra.mxu0 %v56_v18 }
  0x2d   :  { %201 = vmatprep.subr.mxu0 %v71_v19 }
  0x2e   :  { %202 = vmatpush3.msra.mxu0 %v55_v20 }
  0x2f   :  { %203 = vmatprep.subr.mxu0 %v70_v21 }
  0x30   :  { %204 = vmatpush3.msra.mxu0 %v54_v22 }
  0x31   :  { %205 = vmatprep.subr.mxu0 %v69_v23 }
  0x32   :  { %206 = vmatpush3.msra.mxu0 %v53_v24 }
  0x33   :  { %207 = vmatprep.subr.mxu0 %v68_v25 }
  0x34   :  { %208 = vmatpush3.msra.mxu0 %v52_v26 }
  0x35   :  { %209 = vmatprep.subr.mxu0 %v67_v27 }
  0x36   :  { %210 = vmatpush3.msra.mxu0 %v51_v28 }
  0x37   :  { %211 = vmatprep.subr.mxu0 %v66_v29 }
  0x38   :  { %212 = vmatpush3.msra.mxu0 %v50_v30 }
  0x39   :  { %213 = vmatprep.subr.mxu0 %v65_v31 }
  0x3a   :  { %214 = vmatpush3.msra.mxu0 %v49_v32 }
  0x3b   :  { %146 = vmatmul.mubr.f32.vlgmr.msra.gmra.mxu0 %v47_v33 }
  0xfb   :  { %v215_v34 = vpop.f32.mrf.mxu0 }
  0xfd   :  { %v216_v35 = vpop.f32.mrf.mxu0 }
  0xfe   :  { %v217_v36 = vadd.f32 %v216_v35, %v215_v34 }
 0x100   :  { %v164_v38 = vadd.f32 %v217_v36, %v182_v37 }
 0x102   :  { %165 = vst [vmem:[#allocation7] sm:$0xff] %v164_v38 }
 0x103   :  { %275 = shalt.err (!%p272_p0)
}
 0x104   :  { %175 = dma.vmem_to_hbm [thread:$0]  %s173_s25, 128, %s330_s3, [#allocation4]  }
 0x105   :  { %288 = dma.done.wait [#allocation4], 128  }
 0x106   :  { %289 = vsyncadd [#allocation4], 4294967168 }
 0x107   :  { %179 = vsyncpa [#allocation3], 1 }
 0x108   :  { %180 = vsyncpa [#allocation6], 1 }
 0x109   :  { %181 = vsyncpa [#allocation4], 1 }

</bundles_post_ra>
